<compile_context>
chip_gen: v5e
topology: v5e:2x2
jax: 0.10.0
libtpu: 0.0.40
codegen_flags: <defaults>
</compile_context>

<pallas_src>
import math

import jax
import jax.numpy as jnp
from jax.experimental import pallas as pl
from jax.experimental.pallas import tpu as pltpu


def _round_up(x, m):
    return (x + m - 1) // m * m


def _choose_tb(B, S, H, batch_block):
    """Batch rows per grid step."""
    if batch_block is not None:
        tb = int(batch_block)
    else:
        tb = max(1, -(-256 // max(S, 1)))                        # TB*S >= 256 (MXU M fill)
        tb = min(tb, max(1, (8 << 20) // max(S * H * 4, 1)))     # hidden block <= ~8 MiB
    tb = max(1, min(tb, B))
    if tb >= B or B <= 8:
        return B                         # single block spanning the full batch dim
    return max(8, (tb // 8) * 8)         # sublane-aligned (TB, H) output blocks


def _make_iem_kernel(TB, S, H, Fp, Tk, inv_sqrt_h):
    def kernel(h_ref, m_ref, wqk_ref, bqk_ref, o_ref):
        # Masked hidden in f32 (also reused for the final weighted sum).
        h = h_ref[...].astype(jnp.float32)                   # (TB, S, H)
        m = m_ref[...].astype(jnp.float32)                   # (TB, S)
        hm = h * m[:, :, None]                                # (TB, S, H) f32
        hb = hm.astype(jnp.bfloat16).reshape(TB * S, H)       # MXU operand

        # Fused Q|K projection: one matmul over the 2*Fp (=256-wide) N dim.
        proj = jnp.dot(hb, wqk_ref[...],
                       preferred_element_type=jnp.float32) + bqk_ref[...]
        sig = jax.nn.sigmoid(proj)                            # (TB*S, 2*Fp) f32
        q = sig[:, :Fp].reshape(TB, S, Fp)                    # padded cols ~ 0
        k = sig[:, Fp:].reshape(TB, S, Fp)                    # padded cols ~ 0

        # Diagonal of sigmoid(Q K^T), computed directly from the f32 q/k
        # (replaces the eye/where S x S masking of the reference module).
        diag = jax.nn.sigmoid(jnp.sum(q * k, axis=-1))        # (TB, S)

        qb = q.astype(jnp.bfloat16)
        kb = k.astype(jnp.bfloat16)

        # Row-sum of sigmoid(Q K^T) accumulated over key tiles of size <= Tk,
        # so live VMEM state stays O(TB*S*Tk) instead of O(TB*S*S).
        row_sum = jnp.zeros((TB, S), jnp.float32)
        for k0 in range(0, S, Tk):
            k1 = min(k0 + Tk, S)
            logits = jnp.einsum("bqf,bkf->bqk", qb, kb[:, k0:k1, :],
                                preferred_element_type=jnp.float32)
            row_sum = row_sum + jnp.sum(jax.nn.sigmoid(logits), axis=2)

        # Remove the diagonal term; scale once, after the reduction.
        t_sum = (row_sum - diag) * inv_sqrt_h                 # (TB, S)

        # Softmax over the sequence axis (exact reciprocal so t sums to 1;
        # pl.reciprocal(..., approx=True) is the cheaper EUP option if the
        # ~1e-3 relative slack is acceptable downstream).
        t_max = jnp.max(t_sum, axis=1, keepdims=True)
        e = jnp.exp(t_sum - t_max)
        t = e / jnp.sum(e, axis=1, keepdims=True)             # (TB, S)

        # out[b, :] = sum_s t[b, s] * masked_hidden[b, s, :]  (f32 VPU/XLU).
        out = jnp.sum(t[:, :, None] * hm, axis=1)             # (TB, H)
        o_ref[...] = out.astype(o_ref.dtype)

    return kernel


def iem_layer_forward(hidden, mask, wq, bq, wk, bk, hidden_size, *,
                      batch_block=None):
    """hidden: (B,S,H); mask: (B,S); wq/wk: (F,H); bq/bk: (F,). Returns (B,H)."""
    B, S, H = hidden.shape
    F = wq.shape[0]
    Fp = _round_up(F, 128)                 # lane-dense projection width
    inv_sqrt_h = 1.0 / math.sqrt(hidden_size)

    TB = _choose_tb(B, S, H, batch_block)
    Bp = _round_up(B, TB)

    # Key-tile size: keep the (TB, S, Tk) f32 score tile around <= 4 MiB.
    if S <= 512:
        Tk = S
    else:
        Tk = max(128, min(512, (4 << 20) // max(TB * S * 4, 1)))

    # Fused, feature-padded Q|K weight (bf16) and bias (f32). Padded feature
    # columns get bias -30 so sigmoid ~ 0 there and they drop out of Q K^T
    # and the diagonal with no in-kernel masking.
    wqk = jnp.zeros((H, 2 * Fp), jnp.bfloat16)
    wqk = wqk.at[:, :F].set(wq.T.astype(jnp.bfloat16))
    wqk = wqk.at[:, Fp:Fp + F].set(wk.T.astype(jnp.bfloat16))
    bqk = jnp.full((1, 2 * Fp), -30.0, jnp.float32)
    bqk = bqk.at[0, :F].set(bq.astype(jnp.float32))
    bqk = bqk.at[0, Fp:Fp + F].set(bk.astype(jnp.float32))

    # hidden / mask go to the kernel unpadded and uncast (no extra HBM pass);
    # only the batch axis is padded, and only when it does not divide into TB.
    m2 = mask.astype(hidden.dtype)
    h2 = hidden
    if Bp != B:
        h2 = jnp.pad(h2, ((0, Bp - B), (0, 0), (0, 0)))
        m2 = jnp.pad(m2, ((0, Bp - B), (0, 0)))

    kernel = _make_iem_kernel(TB, S, H, Fp, Tk, inv_sqrt_h)

    out = pl.pallas_call(
        kernel,
        out_shape=jax.ShapeDtypeStruct((Bp, H), jnp.float32),
        grid=(Bp // TB,),
        in_specs=[
            pl.BlockSpec((TB, S, H), lambda b: (b, 0, 0)),     # hidden (full S,H)
            pl.BlockSpec((TB, S), lambda b: (b, 0)),           # mask (2-D block)
            pl.BlockSpec((H, 2 * Fp), lambda b: (0, 0)),       # Wq^T | Wk^T
            pl.BlockSpec((1, 2 * Fp), lambda b: (0, 0)),       # bq | bk (-30 pad)
        ],
        out_specs=pl.BlockSpec((TB, H), lambda b: (b, 0)),
        compiler_params=pltpu.CompilerParams(
            dimension_semantics=("parallel",)),
    )(h2, m2, wqk, bqk)

    return out[:B]


def _reference(hidden, mask, wq, bq, wk, bk, hidden_size):
    h = hidden * mask[:, :, None]
    q = jax.nn.sigmoid(jnp.einsum("bsh,fh->bsf", h, wq) + bq)
    k = jax.nn.sigmoid(jnp.einsum("bsh,fh->bsf", h, wk) + bk)
    c = jax.nn.sigmoid(jnp.einsum("bsf,btf->bst", q, k)) / math.sqrt(hidden_size)
    s = h.shape[1]
    eye_m1 = jnp.eye(s) - 1.0
    y = jnp.where(eye_m1[None] < 0, c, jnp.broadcast_to(eye_m1[None], c.shape))
    t = jax.nn.softmax(jnp.sum(y, axis=2), axis=1)
    return jnp.einsum("bs,bsh->bh", t, h)


if __name__ == "__main__":
    B, S, HIDDEN, FEAT = 2, 8, 32, 16

    key = jax.random.PRNGKey(0)
    k_h, k_m, k_wq, k_bq, k_wk, k_bk = jax.random.split(key, 6)

    hidden = jax.random.normal(k_h, (B, S, HIDDEN), dtype=jnp.float32)
    mask = (jax.random.uniform(k_m, (B, S)) > 0.3).astype(jnp.float32)

    # Deterministic param init (nn.Linear-style uniform bounds).
    bound = 1.0 / math.sqrt(HIDDEN)
    wq = jax.random.uniform(k_wq, (FEAT, HIDDEN), minval=-bound, maxval=bound)
    bq = jax.random.uniform(k_bq, (FEAT,), minval=-bound, maxval=bound)
    wk = jax.random.uniform(k_wk, (FEAT, HIDDEN), minval=-bound, maxval=bound)
    bk = jax.random.uniform(k_bk, (FEAT,), minval=-bound, maxval=bound)

    out = iem_layer_forward(hidden, mask, wq, bq, wk, bk, HIDDEN)
    out = jax.block_until_ready(out)

    ref = _reference(hidden, mask, wq, bq, wk, bk, HIDDEN)
    assert out.shape == (B, HIDDEN)
    # Looser tolerance: matmul operands run in bf16 on the MXU (f32 accumulate).
    assert jnp.allclose(out, ref, atol=2e-2, rtol=2e-2), (
        "mismatch vs reference; max abs err = "
        f"{float(jnp.max(jnp.abs(out - ref)))}")

    print("KERNEL_OK")
</pallas_src>

<mosaic_0001>
module attributes {stable_mosaic.version = 11 : i64} {
  func.func @kernel(%arg0: i32, %arg1: memref<2x8x32xf32, #tpu.memory_space<vmem>>, %arg2: memref<2x8xf32, #tpu.memory_space<vmem>>, %arg3: memref<32x256xbf16, #tpu.memory_space<vmem>>, %arg4: memref<1x256xf32, #tpu.memory_space<vmem>>, %arg5: memref<2x32xf32, #tpu.memory_space<vmem>>) attributes {dimension_semantics = [#tpu.dimension_semantics<parallel>], iteration_bounds = array<i64: 1>, scalar_prefetch = 0 : i64, scratch_operands = 0 : i64, tpu.core_type = #tpu.core_type<tc>, window_params = [{transform_indices = @transform_0, window_bounds = array<i64: 2, 8, 32>}, {transform_indices = @transform_1, window_bounds = array<i64: 2, 8>}, {pipeline_mode = #tpu.pipeline_mode<synchronous>, transform_indices = @transform_2, window_bounds = array<i64: 32, 256>}, {pipeline_mode = #tpu.pipeline_mode<synchronous>, transform_indices = @transform_3, window_bounds = array<i64: 1, 256>}, {transform_indices = @transform_4, window_bounds = array<i64: 2, 32>}]} {
    %c0 = arith.constant 0 : index
    %c0_0 = arith.constant 0 : index
    %c0_1 = arith.constant 0 : index
    %0 = vector.load %arg1[%c0, %c0_0, %c0_1] : memref<2x8x32xf32, #tpu.memory_space<vmem>>, vector<2x8x32xf32>
    %c0_2 = arith.constant 0 : index
    %c0_3 = arith.constant 0 : index
    %1 = vector.load %arg2[%c0_2, %c0_3] : memref<2x8xf32, #tpu.memory_space<vmem>>, vector<2x8xf32>
    %2 = vector.shape_cast %1 : vector<2x8xf32> to vector<2x8x1xf32>
    %3 = vector.broadcast %2 : vector<2x8x1xf32> to vector<2x8x32xf32>
    %4 = arith.mulf %0, %3 : vector<2x8x32xf32>
    %5 = arith.truncf %4 : vector<2x8x32xf32> to vector<2x8x32xbf16>
    %6 = vector.shape_cast %5 : vector<2x8x32xbf16> to vector<16x32xbf16>
    %c0_4 = arith.constant 0 : index
    %c0_5 = arith.constant 0 : index
    %7 = vector.load %arg3[%c0_4, %c0_5] : memref<32x256xbf16, #tpu.memory_space<vmem>>, vector<32x256xbf16>
    %cst = arith.constant dense<0.000000e+00> : vector<16x256xf32>
    %8 = tpu.matmul %6, %7, %cst {dimension_numbers = #tpu.dot_dimension_numbers<[1], [0], [0], [1], [0, 0, 1, 1], [], []>} : vector<16x32xbf16>, vector<32x256xbf16>, vector<16x256xf32> -> vector<16x256xf32>
    %c0_6 = arith.constant 0 : index
    %c0_7 = arith.constant 0 : index
    %9 = vector.load %arg4[%c0_6, %c0_7] : memref<1x256xf32, #tpu.memory_space<vmem>>, vector<1x256xf32>
    %10 = vector.broadcast %9 : vector<1x256xf32> to vector<16x256xf32>
    %11 = arith.addf %8, %10 : vector<16x256xf32>
    %12 = arith.negf %11 : vector<16x256xf32>
    %13 = math.exp %12 : vector<16x256xf32>
    %cst_8 = arith.constant 1.000000e+00 : f32
    %14 = vector.broadcast %cst_8 : f32 to vector<16x256xf32>
    %15 = arith.addf %14, %13 : vector<16x256xf32>
    %16 = arith.divf %14, %15 : vector<16x256xf32>
    %17 = vector.extract_strided_slice %16 {offsets = [0, 0], sizes = [16, 128], strides = [1, 1]} : vector<16x256xf32> to vector<16x128xf32>
    %18 = vector.shape_cast %17 : vector<16x128xf32> to vector<2x8x128xf32>
    %19 = vector.extract_strided_slice %16 {offsets = [0, 128], sizes = [16, 128], strides = [1, 1]} : vector<16x256xf32> to vector<16x128xf32>
    %20 = vector.shape_cast %19 : vector<16x128xf32> to vector<2x8x128xf32>
    %21 = arith.mulf %18, %20 : vector<2x8x128xf32>
    %cst_9 = arith.constant dense<0.000000e+00> : vector<2x8xf32>
    %22 = vector.multi_reduction <add>, %21, %cst_9 [2] : vector<2x8x128xf32> to vector<2x8xf32>
    %23 = arith.negf %22 : vector<2x8xf32>
    %24 = math.exp %23 : vector<2x8xf32>
    %cst_10 = arith.constant 1.000000e+00 : f32
    %25 = vector.broadcast %cst_10 : f32 to vector<2x8xf32>
    %26 = arith.addf %25, %24 : vector<2x8xf32>
    %27 = arith.divf %25, %26 : vector<2x8xf32>
    %28 = arith.truncf %18 : vector<2x8x128xf32> to vector<2x8x128xbf16>
    %29 = arith.truncf %20 : vector<2x8x128xf32> to vector<2x8x128xbf16>
    %cst_11 = arith.constant 0.000000e+00 : f32
    %30 = vector.broadcast %cst_11 : f32 to vector<2x8xf32>
    "tpu.trace_start"() <{level = 10 : i32, message = "bqf,bkf->bqk"}> : () -> ()
    %cst_12 = arith.constant dense<0.000000e+00> : vector<2x8x8xf32>
    %31 = tpu.matmul %28, %29, %cst_12 {dimension_numbers = #tpu.dot_dimension_numbers<[2], [2], [1], [1], [0, 0, 0, 1, 1, 1], [0], [0]>} : vector<2x8x128xbf16>, vector<2x8x128xbf16>, vector<2x8x8xf32> -> vector<2x8x8xf32>
    "tpu.trace_stop"() : () -> ()
    %32 = arith.negf %31 : vector<2x8x8xf32>
    %33 = math.exp %32 : vector<2x8x8xf32>
    %cst_13 = arith.constant 1.000000e+00 : f32
    %34 = vector.broadcast %cst_13 : f32 to vector<2x8x8xf32>
    %35 = arith.addf %34, %33 : vector<2x8x8xf32>
    %36 = arith.divf %34, %35 : vector<2x8x8xf32>
    %cst_14 = arith.constant dense<0.000000e+00> : vector<2x8xf32>
    %37 = vector.multi_reduction <add>, %36, %cst_14 [2] : vector<2x8x8xf32> to vector<2x8xf32>
    %38 = arith.addf %30, %37 : vector<2x8xf32>
    %39 = arith.subf %38, %27 : vector<2x8xf32>
    %cst_15 = arith.constant 0.176776692 : f32
    %40 = vector.broadcast %cst_15 : f32 to vector<2x8xf32>
    %41 = arith.mulf %39, %40 : vector<2x8xf32>
    %cst_16 = arith.constant dense<0xFF800000> : vector<2xf32>
    %42 = vector.multi_reduction <maximumf>, %41, %cst_16 [1] : vector<2x8xf32> to vector<2xf32>
    %43 = vector.shape_cast %42 : vector<2xf32> to vector<2x1xf32>
    %44 = vector.broadcast %43 : vector<2x1xf32> to vector<2x8xf32>
    %45 = arith.subf %41, %44 : vector<2x8xf32>
    %46 = math.exp %45 : vector<2x8xf32>
    %cst_17 = arith.constant dense<0.000000e+00> : vector<2xf32>
    %47 = vector.multi_reduction <add>, %46, %cst_17 [1] : vector<2x8xf32> to vector<2xf32>
    %48 = vector.shape_cast %47 : vector<2xf32> to vector<2x1xf32>
    %49 = vector.broadcast %48 : vector<2x1xf32> to vector<2x8xf32>
    %50 = arith.divf %46, %49 : vector<2x8xf32>
    %51 = vector.shape_cast %50 : vector<2x8xf32> to vector<2x8x1xf32>
    %52 = vector.broadcast %51 : vector<2x8x1xf32> to vector<2x8x32xf32>
    %53 = arith.mulf %52, %4 : vector<2x8x32xf32>
    %cst_18 = arith.constant dense<0.000000e+00> : vector<2x32xf32>
    %54 = vector.multi_reduction <add>, %53, %cst_18 [1] : vector<2x8x32xf32> to vector<2x32xf32>
    %c0_19 = arith.constant 0 : index
    %c0_20 = arith.constant 0 : index
    %55 = vector.load %arg5[%c0_19, %c0_20] : memref<2x32xf32, #tpu.memory_space<vmem>>, vector<2x32xf32>
    tpu.vector_store %arg5[%c0_19, %c0_20], %54 {strides = array<i32>} : memref<2x32xf32, #tpu.memory_space<vmem>>, vector<2x32xf32>,
    return
  }
  func.func @transform_0(%arg0: i32) -> (i32, i32, i32) {
    %c0_i32 = arith.constant 0 : i32
    %c0_i32_0 = arith.constant 0 : i32
    %c0_i32_1 = arith.constant 0 : i32
    return %arg0, %c0_i32, %c0_i32_0 : i32, i32, i32
  }
  func.func @transform_1(%arg0: i32) -> (i32, i32) {
    %c0_i32 = arith.constant 0 : i32
    %c0_i32_0 = arith.constant 0 : i32
    return %arg0, %c0_i32 : i32, i32
  }
  func.func @transform_2(%arg0: i32) -> (i32, i32) {
    %c0_i32 = arith.constant 0 : i32
    %c0_i32_0 = arith.constant 0 : i32
    %c0_i32_1 = arith.constant 0 : i32
    return %c0_i32, %c0_i32_0 : i32, i32
  }
  func.func @transform_3(%arg0: i32) -> (i32, i32) {
    %c0_i32 = arith.constant 0 : i32
    %c0_i32_0 = arith.constant 0 : i32
    %c0_i32_1 = arith.constant 0 : i32
    return %c0_i32, %c0_i32_0 : i32, i32
  }
  func.func @transform_4(%arg0: i32) -> (i32, i32) {
    %c0_i32 = arith.constant 0 : i32
    %c0_i32_0 = arith.constant 0 : i32
    return %arg0, %c0_i32 : i32, i32
  }
}

</mosaic_0001>

<bundles_post_ra>
// kernel: tpu_custom_call.1
= control target key start
LH: loop header
LB: loop body
LE: loop exit
PB: predicated region body
PF: predicated region fallthrough
CT: control target
= control target key end

     0   :  { %9 = vsyncpa [#allocation3], 0  ;;  %s730_s0 = inlined_call_operand.hbm [shape: f32[2,8,32], index: 0, kind: input, shape index: {}]   ;;  %s731_s1 = inlined_call_operand.hbm [shape: f32[2,8], index: 1, kind: input, shape index: {}]   ;;  %s732_s2 = inlined_call_operand.hbm [shape: bf16[32,256], index: 2, kind: input, shape index: {}]   ;;  %s733_s3 = inlined_call_operand.vmem [shape: f32[1,256], index: 3, kind: input, shape index: {}]   ;;  %s734_s4 = inlined_call_operand.hbm [shape: f32[2,32], index: 4, kind: output, shape index: {}]  }
   0x1   :  { %10 = vsyncpa [#allocation6], 0  ;;  %s30_s17 = sshll.u32 %s731_s1, 4  ;;  %s31_s17 = int_to_ptr.hbm [resolvable:$true] %s30_s17 }
   0x2   :  { %11 = vsyncpa [#allocation4], 0  ;;  %s660_s18 = smov [#allocation5]   ;;  %s16_s22 = sshll.u32 %s730_s0, 4  ;;  %s17_s22 = int_to_ptr.hbm [resolvable:$true] %s16_s22 }
   0x3   :  { %s32_s19 = sshll.u32 %s660_s18, 4  ;;  %s661_s23 = smov [#allocation2]   ;;  %s33_s19 = int_to_ptr.vmem [resolvable:$true] %s32_s19 }
   0x4   :  { %35 = dma.hbm_to_vmem [thread:$0]  %s31_s17, 32, %s33_s19, [#allocation6]  }
   0x5   :  { %s18_s24 = sshll.u32 %s661_s23, 4  ;;  %s662_s25 = smov 128   ;;  %s19_s24 = int_to_ptr.vmem [resolvable:$true] %s18_s24 }
   0x6   :  { %s663_s26 = smov 8   ;;  %s40_s1 = sshll.u32 %s732_s2, 4  ;;  %s41_s1 = int_to_ptr.hbm [resolvable:$true] %s40_s1 }
   0x7   :  { %24 = dma.hbm_to_vmem [thread:$0]  %s17_s22, 256, %s19_s24, [#allocation3], %s662_s25, %s662_s25, %s663_s26  }
   0x8   :  { %s664_s29 = smov [#allocation7]  }
   0x9   :  { %s42_s30 = sshll.u32 %s664_s29, 4  ;;  %s43_s30 = int_to_ptr.vmem [resolvable:$true] %s42_s30 }
   0xa   :  { %48 = dma.hbm_to_vmem [thread:$0]  %s41_s1, 512, %s43_s30, [#allocation6], %s662_s25, %s662_s25, %s663_s26  }
   0xb   :  { %654 = dma.done.wait [#allocation3], 256  }
   0xc   :  { %655 = vsyncadd [#allocation3], 4294967040 }
   0xd   :  { %656 = dma.done.wait [#allocation6], 544  }
   0xe   :  { %657 = vsyncadd [#allocation6], 4294966752  ;;  %v68_v0 = vlaneseq  ;;  %v66_v2 = vld [vmem:[#allocation5] sm:$0x3]  ;;  %v487_v5 = vld [vmem:[#allocation7 + $0x10] sm:$0xf] }
   0xf   :  { %v67_v3 = vperm.slane %v66_v2, 0  ;;  %v74_v4 = vperm.slane %v66_v2, 1  ;;  %v506_v6 = vld [vmem:[#allocation7 + $0x14] sm:$0xf0]  ;;  %v505_v7 = vld [vmem:[#allocation7 + $0x14] sm:$0xf] }
  0x10   :  { %v69_v1 = vshrl.u32 %v68_v0, 7  ;;  %v488_v8 = vor.u32 %v506_v6, %v487_v5  ;;  %v489_v9 = vld [vmem:[#allocation7 + $0x18] sm:$0xf0]  ;;  %v479_v11 = vld [vmem:[#allocation7] sm:$0xf]  ;;  %v64_v18 = vld [vmem:[#allocation2] sm:$0xff] }
  0x11   :  { %v492_v10 = vor.u32 %v505_v7, %v489_v9  ;;  %v504_v12 = vld [vmem:[#allocation7 + $0x4] sm:$0xf0]  ;;  %v503_v13 = vld [vmem:[#allocation7 + $0x4] sm:$0xf]  ;;  %v481_v15 = vld [vmem:[#allocation7 + $0x8] sm:$0xf0] }
  0x12   :  { %514 = vset.pattern.permute.xlu0 %v69_v1  ;;  %130 = vmatpush.bf16.msra.mxu0 %v488_v8  ;;  %v480_v14 = vor.u32 %v504_v12, %v479_v11  ;;  %v484_v16 = vor.u32 %v503_v13, %v481_v15  ;;  %v65_v20 = vld [vmem:[#allocation2 + $0x8] sm:$0xff]  ;;  %vm120_vm0 = vcmask 261120   ;;  %v89_v28 = vld [vmem:[%s733_s3] sm:$0x3]  ;;  %s666_s3 = smov [#allocation8]   ;;  %s466_s8 = sshll.u32 %s734_s4, 4  ;;  %s467_s8 = int_to_ptr.hbm [resolvable:$true] %s466_s8 }
  0x13   :  { %144 = vmatpush.bf16.msra.mxu1 %v492_v10  ;;  %v91_v29 = vperm.slane %v89_v28, 0  ;;  %v92_v30 = vperm.slane %v89_v28, 1  ;;  %s464_s5 = sshll.u32 %s666_s3, 4  ;;  %s465_s5 = int_to_ptr.vmem [resolvable:$true] %s464_s5 }
  0x16   :  { %131 = vmatpush.bf16.msra.mxu0 %v480_v14 }
  0x17   :  { %145 = vmatpush.bf16.msra.mxu1 %v484_v16 }
  0x1a   :  { %72 = vperm.xlu0 %514, %v67_v3  }
  0x22   :  { %79 = vperm.xlu0 %514, %v74_v4  }
  0x8c   :  { %v73_v17 = vpop.permute.xlu0 %72 }
  0x8d   :  { %v702_v19 = vmul.f32 %v73_v17, %v64_v18 }
  0x8f   :  { %v83_v22 = vpack.c.bf16 %v702_v19, %v702_v19 }
  0x91   :  { %v97_v25 = vunpack.c.l.b16 %v83_v22 }
  0x94   :  { %v80_v21 = vpop.permute.xlu0 %79 }
  0x95   :  { %v706_v23 = vmul.f32 %v80_v21, %v65_v20 }
  0x97   :  { %v84_v24 = vpack.c.bf16 %v706_v23, %v706_v23 }
  0x99   :  { %v98_v26 = vunpack.c.l.b16 %v84_v24 }
  0x9b   :  { %v99_v27 = vpack.c.b16 %v98_v26, %v97_v25 }
  0x9d   :  { %493 = vmatmul.msk.bf16.vlgmr.msra.gmra.mxu0 %vm120_vm0, %v99_v27  ;;  %494 = vmatmul.msk.bf16.vlgmr.msra.gmra.mxu1 %vm120_vm0, %v99_v27 }
 0x11a   :  { %v133_v31 = vpop.f32.mrf.mxu0  ;;  %v147_v32 = vpop.f32.mrf.mxu1 }
 0x11b   :  { %v134_v33 = vadd.f32 %v133_v31, %v91_v29  ;;  %v148_v34 = vadd.f32 %v147_v32, %v92_v30 }
 0x11d   :  { %v495_v35 = vmul.f32 -1.442695, %v134_v33  ;;  %v496_v36 = vmul.f32 -1.442695, %v148_v34 }
 0x11f   :  { %518 = vpow2.f32 %v495_v35 }
 0x120   :  { %520 = vpow2.f32 %v496_v36 }
 0x122   :  { %v135_v37 = vpop.f32.mrf.mxu0  ;;  %v149_v38 = vpop.f32.mrf.mxu1 }
 0x123   :  { %v136_v39 = vadd.f32 %v135_v37, %v91_v29  ;;  %v150_v40 = vadd.f32 %v149_v38, %v92_v30 }
 0x125   :  { %v519_v41 = vpop.eup %518  ;;  %v497_v42 = vmul.f32 -1.442695, %v136_v39  ;;  %v498_v45 = vmul.f32 -1.442695, %v150_v40 }
 0x126   :  { %v521_v43 = vpop.eup %520  ;;  %v164_v44 = vadd.f32 1.0, %v519_v41 }
 0x127   :  { %v165_v46 = vadd.f32 1.0, %v521_v43  ;;  %522 = vpow2.f32 %v497_v42 }
 0x128   :  { %524 = vrcp.f32 %v164_v44  ;;  %v177_v57 = vand.u32 2147483647, %v164_v44  ;;  %v179_v58 = vand.u32 2147483648, %v164_v44  ;;  %vm173_vm3 = vweird.f32 %v164_v44 }
 0x129   :  { %526 = vrcp.f32 %v165_v46  ;;  %v194_v59 = vand.u32 2147483648, %v165_v46  ;;  %v192_v62 = vand.u32 2147483647, %v165_v46  ;;  %vm188_vm4 = vweird.f32 %v165_v46 }
 0x12a   :  { %528 = vpow2.f32 %v498_v45  ;;  %v180_v3 = vor.u32 1.1754944e-38, %v179_v58  ;;  %vm178_vm7 = vcmp.eq.f32.partialorder %v177_v57, 8.507059e+37 }
 0x12b   :  { %v195_v4 = vor.u32 1.1754944e-38, %v194_v59  ;;  %vm193_vm8 = vcmp.eq.f32.partialorder %v192_v62, 8.507059e+37 }
 0x12d   :  { %v523_v47 = vpop.eup %522 }
 0x12e   :  { %v525_v48 = vpop.eup %524  ;;  %v166_v49 = vadd.f32 1.0, %v523_v47 }
 0x12f   :  { %v527_v50 = vpop.eup %526  ;;  %v169_v51 = vmul.f32 %v525_v48, %v164_v44  ;;  %vm174_vm1 = vweird.f32 %v525_v48 }
 0x130   :  { %v529_v52 = vpop.eup %528  ;;  %530 = vrcp.f32 %v166_v49  ;;  %v184_v53 = vmul.f32 %v527_v50, %v165_v46  ;;  %vm189_vm2 = vweird.f32 %v527_v50  ;;  %vm175_vm5 = vmor %vm173_vm3, %vm174_vm1  ;;  %v209_v16 = vand.u32 2147483648, %v166_v49 }
 0x131   :  { %v167_v54 = vadd.f32 1.0, %v529_v52  ;;  %v170_v55 = vsub.f32 1.0, %v169_v51  ;;  %vm190_vm6 = vmor %vm188_vm4, %vm189_vm2  ;;  %v207_v18 = vand.u32 2147483647, %v166_v49  ;;  %vm203_vm10 = vweird.f32 %v166_v49 }
 0x132   :  { %v185_v56 = vsub.f32 1.0, %v184_v53  ;;  %v210_v26 = vor.u32 1.1754944e-38, %v209_v16 }
 0x133   :  { %532 = vrcp.f32 %v167_v54  ;;  %v171_v60 = vmul.f32 %v525_v48, %v170_v55  ;;  %v224_v20 = vand.u32 2147483648, %v167_v54  ;;  %v222_v24 = vand.u32 2147483647, %v167_v54 }
 0x134   :  { %v186_v61 = vmul.f32 %v527_v50, %v185_v56  ;;  %vm218_vm13 = vweird.f32 %v167_v54  ;;  %vm208_vm14 = vcmp.eq.f32.partialorder %v207_v18, 8.507059e+37 }
 0x135   :  { %v172_v63 = vadd.f32 %v525_v48, %v171_v60  ;;  %v225_v29 = vor.u32 1.1754944e-38, %v224_v20  ;;  %vm223_vm1 = vcmp.eq.f32.partialorder %v222_v24, 8.507059e+37 }
 0x136   :  { %v531_v1 = vpop.eup %530  ;;  %v187_v2 = vadd.f32 %v527_v50, %v186_v61 }
 0x137   :  { %v176_v5 = vsel %vm175_vm5, %v525_v48, %v172_v63  ;;  %v199_v6 = vmul.f32 %v531_v1, %v166_v49  ;;  %vm204_vm9 = vweird.f32 %v531_v1  ;;  %vm340_vm5 = vcmask 64512  }
 0x138   :  { %v191_v7 = vsel %vm190_vm6, %v527_v50, %v187_v2  ;;  %v181_v8 = vsel %vm178_vm7, %v180_v3, %v176_v5  ;;  %vm205_vm12 = vmor %vm203_vm10, %vm204_vm9 }
 0x139   :  { %v533_v9 = vpop.eup %532  ;;  %v196_v10 = vsel %vm193_vm8, %v195_v4, %v191_v7  ;;  %v200_v11 = vsub.f32 1.0, %v199_v6  ;;  %v272_v28 = vpack.c.bf16 %v181_v8, %v181_v8 }
 0x13a   :  { %v274_v12 = vpack.c.bf16 %v196_v10, %v196_v10  ;;  %v228_v13 = vmul.f32 %v196_v10, %v181_v8  ;;  %v214_v14 = vmul.f32 %v533_v9, %v167_v54  ;;  %vm219_vm11 = vweird.f32 %v533_v9 }
 0x13b   :  { %v201_v15 = vmul.f32 %v531_v1, %v200_v11  ;;  %vm220_vm15 = vmor %vm218_vm13, %vm219_vm11 }
 0x13c   :  { %283 = vmatpush.bf16.xpose.msra.mxu2 %v274_v12  ;;  %230 = vadd.xlane.f32.xlu1 %v228_v13  ;;  %v215_v17 = vsub.f32 1.0, %v214_v14 }
 0x13d   :  { %v202_v21 = vadd.f32 %v531_v1, %v201_v15 }
 0x13e   :  { %v216_v22 = vmul.f32 %v533_v9, %v215_v17 }
 0x13f   :  { %v206_v25 = vsel %vm205_vm12, %v531_v1, %v202_v21 }
 0x140   :  { %v217_v27 = vadd.f32 %v533_v9, %v216_v22  ;;  %v211_v30 = vsel %vm208_vm14, %v210_v26, %v206_v25 }
 0x141   :  { %v273_v35 = vpack.c.bf16 %v211_v30, %v211_v30 }
 0x142   :  { %v221_v31 = vsel %vm220_vm15, %v533_v9, %v217_v27 }
 0x143   :  { %284 = vmatmul.bf16.vlgmr.msra.gmra.mxu2 %v272_v28  ;;  %v226_v32 = vsel %vm223_vm1, %v225_v29, %v221_v31 }
 0x144   :  { %v275_v33 = vpack.c.bf16 %v226_v32, %v226_v32  ;;  %v229_v34 = vmul.f32 %v226_v32, %v211_v30 }
 0x146   :  { %296 = vmatpush.bf16.xpose.msra.mxu3 %v275_v33  ;;  %232 = vadd.xlane.f32.xlu1 %v229_v34 }
 0x14d   :  { %297 = vmatmul.bf16.vlgmr.msra.gmra.mxu3 %v273_v35 }
 0x1af   :  { %v231_v5 = vpop.xlane.xlu1 %230 }
 0x1b0   :  { %v499_v6 = vmul.f32 -1.442695, %v231_v5 }
 0x1b9   :  { %v233_v7 = vpop.xlane.xlu1 %232 }
 0x1ba   :  { %v500_v8 = vmul.f32 -1.442695, %v233_v7 }
 0x1c6   :  { %v285_v36 = vpop.f32.mrf.mxu2 }
 0x1c7   :  { %v501_v37 = vmul.f32 -1.442695, %v285_v36 }
 0x1c9   :  { %534 = vpow2.f32 %v501_v37 }
 0x1ce   :  { %v287_v38 = vpop.f32.mrf.mxu2 }
 0x1cf   :  { %v535_v39 = vpop.eup %534  ;;  %v356_v38 = vand.u32 127, %v68_v0 }
 0x1d0   :  { %v308_v40 = vadd.f32 1.0, %v535_v39  ;;  %v298_v41 = vpop.f32.mrf.mxu3 }
 0x1d1   :  { %v502_v42 = vmul.f32 -1.442695, %v298_v41 }
 0x1d2   :  { %536 = vrcp.f32 %v308_v40  ;;  %v321_v49 = vand.u32 2147483648, %v308_v40  ;;  %v319_v51 = vand.u32 2147483647, %v308_v40  ;;  %vm315_vm3 = vweird.f32 %v308_v40 }
 0x1d3   :  { %538 = vpow2.f32 %v502_v42 }
 0x1d4   :  { %v322_v53 = vor.u32 1.1754944e-38, %v321_v49  ;;  %vm320_vm6 = vcmp.eq.f32.partialorder %v319_v51, 8.507059e+37 }
 0x1d8   :  { %v537_v43 = vpop.eup %536  ;;  %v300_v44 = vpop.f32.mrf.mxu3 }
 0x1d9   :  { %v539_v45 = vpop.eup %538  ;;  %v311_v46 = vmul.f32 %v537_v43, %v308_v40  ;;  %vm316_vm2 = vweird.f32 %v537_v43 }
 0x1da   :  { %v309_v47 = vadd.f32 1.0, %v539_v45  ;;  %vm317_vm4 = vmor %vm315_vm3, %vm316_vm2 }
 0x1db   :  { %v312_v48 = vsub.f32 1.0, %v311_v46  ;;  %v665_v46 = vmov 0  }
 0x1dc   :  { %540 = vrcp.f32 %v309_v47  ;;  %v336_v60 = vand.u32 2147483648, %v309_v47  ;;  %v334_v62 = vand.u32 2147483647, %v309_v47  ;;  %vm330_vm8 = vweird.f32 %v309_v47  ;;  %516 = vset.pattern.permute.xlu2 %v665_v46  ;;  %515 = vset.pattern.permute.xlu1 %v665_v46 }
 0x1dd   :  { %v313_v50 = vmul.f32 %v537_v43, %v312_v48  ;;  %542 = vpow2.f32 %v499_v6  ;;  %517 = vset.pattern.permute.xlu0 %v665_v46 }
 0x1de   :  { %v337_v1 = vor.u32 1.1754944e-38, %v336_v60  ;;  %vm335_vm10 = vcmp.eq.f32.partialorder %v334_v62, 8.507059e+37  ;;  %544 = vpow2.f32 %v500_v8 }
 0x1df   :  { %v314_v52 = vadd.f32 %v537_v43, %v313_v50 }
 0x1e1   :  { %v318_v54 = vsel %vm317_vm4, %v537_v43, %v314_v52  ;;  %vm359_vm4 = vcmask 1041409  }
 0x1e2   :  { %v541_v55 = vpop.eup %540  ;;  %v323_v56 = vsel %vm320_vm6, %v322_v53, %v318_v54 }
 0x1e3   :  { %v341_v57 = vsel %vm340_vm5, %v323_v56, 0.0  ;;  %v326_v58 = vmul.f32 %v541_v55, %v309_v47  ;;  %vm331_vm7 = vweird.f32 %v541_v55  ;;  %v543_v9 = vpop.eup %542 }
 0x1e4   :  { %342 = vadd.xlane.f32.xlu2 %v341_v57  ;;  %vm332_vm9 = vmor %vm330_vm8, %vm331_vm7  ;;  %v240_v10 = vadd.f32 1.0, %v543_v9  ;;  %v545_v11 = vpop.eup %544 }
 0x1e5   :  { %v327_v59 = vsub.f32 1.0, %v326_v58  ;;  %v241_v12 = vadd.f32 1.0, %v545_v11 }
 0x1e6   :  { %546 = vrcp.f32 %v240_v10  ;;  %v253_v25 = vand.u32 2147483648, %v240_v10  ;;  %vm247_vm12 = vweird.f32 %v240_v10  ;;  %v251_v26 = vand.u32 2147483647, %v240_v10 }
 0x1e7   :  { %v328_v61 = vmul.f32 %v541_v55, %v327_v59  ;;  %548 = vrcp.f32 %v241_v12  ;;  %v268_v30 = vand.u32 2147483648, %v241_v12  ;;  %vm262_vm1 = vweird.f32 %v241_v12 }
 0x1e8   :  { %v254_v29 = vor.u32 1.1754944e-38, %v253_v25  ;;  %vm252_vm15 = vcmp.eq.f32.partialorder %v251_v26, 8.507059e+37  ;;  %v266_v31 = vand.u32 2147483647, %v241_v12 }
 0x1e9   :  { %v329_v63 = vadd.f32 %v541_v55, %v328_v61  ;;  %v269_v35 = vor.u32 1.1754944e-38, %v268_v30 }
 0x1ea   :  { %vm267_vm3 = vcmp.eq.f32.partialorder %v266_v31, 8.507059e+37 }
 0x1eb   :  { %v333_v2 = vsel %vm332_vm9, %v541_v55, %v329_v63 }
 0x1ec   :  { %v338_v3 = vsel %vm335_vm10, %v337_v1, %v333_v2  ;;  %v547_v13 = vpop.eup %546 }
 0x1ed   :  { %v344_v4 = vsel %vm340_vm5, %v338_v3, 0.0  ;;  %v243_v14 = vmul.f32 %v547_v13, %v240_v10  ;;  %v549_v15 = vpop.eup %548  ;;  %vm248_vm11 = vweird.f32 %v547_v13  ;;  %vm362_vm5 = vcmask 58368  }
 0x1ee   :  { %345 = vadd.xlane.f32.xlu2 %v344_v4  ;;  %v258_v17 = vmul.f32 %v549_v15, %v241_v12  ;;  %vm249_vm13 = vmor %vm247_vm12, %vm248_vm11  ;;  %vm263_vm14 = vweird.f32 %v549_v15 }
 0x1ef   :  { %v244_v16 = vsub.f32 1.0, %v243_v14  ;;  %vm264_vm2 = vmor %vm262_vm1, %vm263_vm14  ;;  %vm457_vm14 = vcmask 254976  }
 0x1f0   :  { %v259_v20 = vsub.f32 1.0, %v258_v17 }
 0x1f1   :  { %v245_v18 = vmul.f32 %v547_v13, %v244_v16 }
 0x1f2   :  { %v260_v22 = vmul.f32 %v549_v15, %v259_v20 }
 0x1f3   :  { %v246_v21 = vadd.f32 %v547_v13, %v245_v18 }
 0x1f4   :  { %v261_v28 = vadd.f32 %v549_v15, %v260_v22 }
 0x1f5   :  { %v250_v27 = vsel %vm249_vm13, %v547_v13, %v246_v21 }
 0x1f6   :  { %v255_v32 = vsel %vm252_vm15, %v254_v29, %v250_v27  ;;  %v265_v34 = vsel %vm264_vm2, %v549_v15, %v261_v28 }
 0x1f7   :  { %v270_v37 = vsel %vm267_vm3, %v269_v35, %v265_v34 }
 0x257   :  { %v343_v24 = vpop.xlane.xlu2 %342 }
 0x258   :  { %v349_v33 = vsub.f32 %v343_v24, %v255_v32 }
 0x25a   :  { %v351_v39 = vmul.f32 0.17677669, %v349_v33 }
 0x25c   :  { %v357_v42 = vperm.slane %v351_v39, %v356_v38 }
 0x261   :  { %v346_v36 = vpop.xlane.xlu2 %345 }
 0x262   :  { %v350_v40 = vsub.f32 %v346_v36, %v270_v37 }
 0x264   :  { %v352_v41 = vmul.f32 0.17677669, %v350_v40 }
 0x266   :  { %v358_v43 = vperm.slane %v352_v41, %v356_v38 }
 0x268   :  { %v360_v44 = vsel %vm359_vm4, %v358_v43, %v357_v42 }
 0x269   :  { %v363_v45 = vsel %vm362_vm5, %v360_v44, -inf }
 0x26a   :  { %364 = vmax.xlane.f32.xlu0 %v363_v45 }
 0x2dd   :  { %v365_v47 = vpop.xlane.xlu0 %364 }
 0x2de   :  { %v367_v48 = vperm.slane %v365_v47, 0  ;;  %v368_v49 = vperm.slane %v365_v47, 1 }
 0x2e0   :  { %v371_v0 = vsub.f32 %v351_v39, %v367_v48  ;;  %v372_v50 = vsub.f32 %v352_v41, %v368_v49 }
 0x2e2   :  { %v373_v51 = vmul.f32 1.442695, %v371_v0  ;;  %v375_v52 = vmul.f32 1.442695, %v372_v50 }
 0x2e4   :  { %550 = vpow2.f32 %v373_v51 }
 0x2e5   :  { %552 = vpow2.f32 %v375_v52 }
 0x2ea   :  { %v551_v53 = vpop.eup %550 }
 0x2eb   :  { %v553_v54 = vpop.eup %552  ;;  %380 = vperm.xlu1 %515, %v551_v53  }
 0x2ec   :  { %383 = vperm.xlu2 %516, %v553_v54  }
 0x346   :  { %v384_v55 = vpop.permute.xlu2 %383 }
 0x347   :  { %v386_v57 = vperm.slane %v384_v55, %v356_v38 }
 0x35d   :  { %v381_v56 = vpop.permute.xlu1 %380 }
 0x35e   :  { %v385_v58 = vperm.slane %v381_v56, %v356_v38 }
 0x360   :  { %v387_v59 = vsel %vm359_vm4, %v386_v57, %v385_v58 }
 0x361   :  { %v389_v60 = vsel %vm362_vm5, %v387_v59, 0.0 }
 0x362   :  { %390 = vadd.xlane.f32.xlu2 %v389_v60 }
 0x3d5   :  { %v391_v61 = vpop.xlane.xlu2 %390 }
 0x3d6   :  { %v393_v62 = vperm.slane %v391_v61, 0  ;;  %v394_v63 = vperm.slane %v391_v61, 1 }
 0x3d8   :  { %554 = vrcp.f32 %v393_v62  ;;  %v408_v7 = vand.u32 2147483648, %v393_v62  ;;  %v406_v9 = vand.u32 2147483647, %v393_v62  ;;  %vm402_vm7 = vweird.f32 %v393_v62 }
 0x3d9   :  { %556 = vrcp.f32 %v394_v63  ;;  %v423_v16 = vand.u32 2147483648, %v394_v63  ;;  %vm417_vm11 = vweird.f32 %v394_v63  ;;  %v421_v18 = vand.u32 2147483647, %v394_v63 }
 0x3da   :  { %v409_v12 = vor.u32 1.1754944e-38, %v408_v7  ;;  %vm407_vm9 = vcmp.eq.f32.partialorder %v406_v9, 8.507059e+37 }
 0x3db   :  { %v424_v21 = vor.u32 1.1754944e-38, %v423_v16  ;;  %vm422_vm13 = vcmp.eq.f32.partialorder %v421_v18, 8.507059e+37 }
 0x3de   :  { %v555_v1 = vpop.eup %554 }
 0x3df   :  { %v557_v2 = vpop.eup %556  ;;  %v398_v3 = vmul.f32 %v555_v1, %v393_v62  ;;  %vm403_vm6 = vweird.f32 %v555_v1 }
 0x3e0   :  { %v413_v4 = vmul.f32 %v557_v2, %v394_v63  ;;  %vm404_vm8 = vmor %vm402_vm7, %vm403_vm6  ;;  %vm418_vm10 = vweird.f32 %v557_v2 }
 0x3e1   :  { %v399_v5 = vsub.f32 1.0, %v398_v3  ;;  %vm419_vm12 = vmor %vm417_vm11, %vm418_vm10 }
 0x3e2   :  { %v414_v6 = vsub.f32 1.0, %v413_v4 }
 0x3e3   :  { %v400_v8 = vmul.f32 %v555_v1, %v399_v5 }
 0x3e4   :  { %v415_v10 = vmul.f32 %v557_v2, %v414_v6 }
 0x3e5   :  { %v401_v11 = vadd.f32 %v555_v1, %v400_v8 }
 0x3e6   :  { %v416_v14 = vadd.f32 %v557_v2, %v415_v10 }
 0x3e7   :  { %v405_v13 = vsel %vm404_vm8, %v555_v1, %v401_v11 }
 0x3e8   :  { %v410_v15 = vsel %vm407_vm9, %v409_v12, %v405_v13  ;;  %v420_v20 = vsel %vm419_vm12, %v557_v2, %v416_v14 }
 0x3e9   :  { %v411_v17 = vmul.f32 %v551_v53, %v410_v15  ;;  %v425_v22 = vsel %vm422_vm13, %v424_v21, %v420_v20 }
 0x3ea   :  { %v426_v24 = vmul.f32 %v553_v54, %v425_v22 }
 0x3eb   :  { %429 = vperm.xlu1 %515, %v411_v17  }
 0x3f3   :  { %434 = vperm.xlu1 %515, %v426_v24  }
 0x45d   :  { %v430_v25 = vpop.permute.xlu1 %429 }
 0x45e   :  { %v437_v26 = vmul.f32 %v430_v25, %v702_v19 }
 0x460   :  { %v439_v27 = vsel %vm120_vm0, %v437_v26, 0.0 }
 0x461   :  { %v440_v28 = vrot.slane %v439_v27, 4 }
 0x463   :  { %v441_v29 = vadd.f32 %v440_v28, %v439_v27 }
 0x465   :  { %v435_v30 = vpop.permute.xlu1 %434  ;;  %v442_v32 = vrot.slane %v441_v29, 2 }
 0x466   :  { %v438_v31 = vmul.f32 %v435_v30, %v706_v23 }
 0x467   :  { %v443_v35 = vadd.f32 %v442_v32, %v441_v29 }
 0x468   :  { %v446_v33 = vsel %vm120_vm0, %v438_v31, 0.0 }
 0x469   :  { %v447_v34 = vrot.slane %v446_v33, 4  ;;  %v444_v38 = vrot.slane %v443_v35, 1 }
 0x46b   :  { %v448_v36 = vadd.f32 %v447_v34, %v446_v33  ;;  %v445_v19 = vadd.f32 %v444_v38, %v443_v35 }
 0x46d   :  { %v449_v37 = vrot.slane %v448_v36, 2 }
 0x46f   :  { %v450_v39 = vadd.f32 %v449_v37, %v448_v36 }
 0x471   :  { %v451_v40 = vrot.slane %v450_v39, 1 }
 0x473   :  { %v452_v41 = vadd.f32 %v451_v40, %v450_v39 }
 0x475   :  { %v455_v23 = vsel %vm359_vm4, %v452_v41, %v445_v19 }
 0x476   :  { %458 = vst.msk [vmem:[#allocation8] sm:$0x3] %vm457_vm14, %v455_v23 }
 0x477   :  { %469 = dma.vmem_to_hbm [thread:$0]  %s465_s5, 32, %s467_s8, [#allocation4]  }
 0x478   :  { %658 = dma.done.wait [#allocation4], 32  }
 0x479   :  { %659 = vsyncadd [#allocation4], 4294967264 }
 0x47a   :  { %474 = vsyncpa [#allocation3], 1 }
 0x47b   :  { %475 = vsyncpa [#allocation6], 1 }
 0x47c   :  { %476 = vsyncpa [#allocation4], 1 }

</bundles_post_ra>
